<compile_context>
chip_gen: v5e
topology: v5e:2x2
jax: 0.10.0
libtpu: 0.0.40
codegen_flags: <defaults>
</compile_context>

<pallas_src>
import jax
import jax.numpy as jnp
from jax.experimental import pallas as pl
from jax.experimental.pallas import tpu as pltpu


# ---------------- kernels ----------------
def _add_row_bias_kernel(x_ref, b_ref, o_ref):
    # x: (TN, TF), b: (1, TF) -> broadcast over rows
    o_ref[...] = x_ref[...] + b_ref[...]


def _add_col_bias_kernel(x_ref, b_ref, o_ref):
    # x: (TN, TF), b: (TN, 1) -> broadcast over lanes
    o_ref[...] = x_ref[...] + b_ref[...]


# ---------------- tiling constants ----------------
_TN = 512    # row tile (sublane axis), multiple of 8
_TF = 1024   # col tile (lane axis),    multiple of 128
_VMEM_LIMIT = 32 * 1024 * 1024   # raise v5e's 16 MiB default; safe on v6e/v7x
_MIN_PALLAS_ELEMS = 1 << 16      # below this, plain JAX (let XLA fuse it)


def _tile(dim, tmax):
    # Either the full dim (allowed regardless of alignment) or an aligned tile.
    return dim if dim <= tmax else tmax


# ---------------- 2D case: x (N, F) + bias (F,) ----------------
def addbias_2d(x, bias):
    N, F = x.shape
    b2d = bias.reshape(1, F).astype(x.dtype)
    tn = _tile(N, _TN)
    tf = _tile(F, _TF)
    grid = (pl.cdiv(N, tn), pl.cdiv(F, tf))
    return pl.pallas_call(
        _add_row_bias_kernel,
        out_shape=jax.ShapeDtypeStruct((N, F), x.dtype),
        grid=grid,
        in_specs=[
            pl.BlockSpec((tn, tf), lambda i, j: (i, j)),
            pl.BlockSpec((1, tf), lambda i, j: (0, j)),
        ],
        out_specs=pl.BlockSpec((tn, tf), lambda i, j: (i, j)),
        compiler_params=pltpu.CompilerParams(
            dimension_semantics=("parallel", "parallel"),
            vmem_limit_bytes=_VMEM_LIMIT,
        ),
    )(x, b2d)


# ---------------- 4D case: x (N, C, H, W) + bias (C,) ----------------
def addbias_4d(x, bias):
    N, C, H, W = x.shape
    HW = H * W
    R = N * C
    # Collapse N into the sublane axis; keep HW lane-dense.
    x2 = x.reshape(R, HW)
    # Per-row bias column: row r = n*C + c -> bias[c].  Tiny (R*4 bytes).
    bcol = jnp.tile(bias.astype(x.dtype), N).reshape(R, 1)
    tn = _tile(R, _TN)
    tf = _tile(HW, _TF)
    grid = (pl.cdiv(R, tn), pl.cdiv(HW, tf))
    out = pl.pallas_call(
        _add_col_bias_kernel,
        out_shape=jax.ShapeDtypeStruct((R, HW), x.dtype),
        grid=grid,
        in_specs=[
            pl.BlockSpec((tn, tf), lambda i, j: (i, j)),
            pl.BlockSpec((tn, 1), lambda i, j: (i, 0)),
        ],
        out_specs=pl.BlockSpec((tn, tf), lambda i, j: (i, j)),
        compiler_params=pltpu.CompilerParams(
            dimension_semantics=("parallel", "parallel"),
            vmem_limit_bytes=_VMEM_LIMIT,
        ),
    )(x2, bcol)
    return out.reshape(N, C, H, W)


def add_bias(x, bias, *, force_pallas=False):
    """Dispatch like AddBias.forward: 2D vs 4D input.

    For tiny tensors the custom-call boundary costs more than the add and
    blocks XLA fusion, so fall back to plain JAX unless force_pallas=True.
    """
    if not force_pallas and x.size < _MIN_PALLAS_ELEMS:
        if x.ndim == 2:
            return x + bias.reshape(1, -1).astype(x.dtype)
        return x + bias.reshape(1, -1, 1, 1).astype(x.dtype)
    if x.ndim == 2:
        return addbias_2d(x, bias)
    return addbias_4d(x, bias)


if __name__ == "__main__":
    key = jax.random.PRNGKey(0)
    k1, k2, k3, k4, k5, k6, k7, k8 = jax.random.split(key, 8)

    # --- small 4D case (module-consistent shapes): x (2, 4, 16, 16), bias (4,) ---
    x4 = jax.random.normal(k1, (2, 4, 16, 16), dtype=jnp.float32)
    bias4 = jax.random.normal(k2, (4,), dtype=jnp.float32)
    out4 = jax.block_until_ready(add_bias(x4, bias4, force_pallas=True))
    ref4 = x4 + bias4.reshape(1, 4, 1, 1)
    assert jnp.allclose(out4, ref4, atol=1e-6), "4D AddBias mismatch (small)"

    # --- small 2D case: x (2, 32), bias (32,) ---
    x2 = jax.random.normal(k3, (2, 32), dtype=jnp.float32)
    bias2 = jax.random.normal(k4, (32,), dtype=jnp.float32)
    out2 = jax.block_until_ready(add_bias(x2, bias2, force_pallas=True))
    ref2 = x2 + bias2.reshape(1, 32)
    assert jnp.allclose(out2, ref2, atol=1e-6), "2D AddBias mismatch (small)"

    # --- larger 2D case exercising the tiled grid + ragged row edge ---
    x2b = jax.random.normal(k5, (1040, 384), dtype=jnp.float32)
    bias2b = jax.random.normal(k6, (384,), dtype=jnp.float32)
    out2b = jax.block_until_ready(add_bias(x2b, bias2b))
    ref2b = x2b + bias2b.reshape(1, 384)
    assert jnp.allclose(out2b, ref2b, atol=1e-6), "2D AddBias mismatch (tiled)"

    # --- larger 4D case exercising lane tiling + ragged lane edge ---
    x4b = jax.random.normal(k7, (40, 8, 48, 48), dtype=jnp.float32)
    bias4b = jax.random.normal(k8, (8,), dtype=jnp.float32)
    out4b = jax.block_until_ready(add_bias(x4b, bias4b))
    ref4b = x4b + bias4b.reshape(1, 8, 1, 1)
    assert jnp.allclose(out4b, ref4b, atol=1e-6), "4D AddBias mismatch (tiled)"

    print("KERNEL_OK")
</pallas_src>

<mosaic_0001>
module attributes {stable_mosaic.version = 11 : i64} {
  func.func @_add_col_bias_kernel(%arg0: i32, %arg1: i32, %arg2: memref<8x256xf32, #tpu.memory_space<vmem>>, %arg3: memref<8x1xf32, #tpu.memory_space<vmem>>, %arg4: memref<8x256xf32, #tpu.memory_space<vmem>>) attributes {dimension_semantics = [#tpu.dimension_semantics<parallel>, #tpu.dimension_semantics<parallel>], iteration_bounds = array<i64: 1, 1>, scalar_prefetch = 0 : i64, scratch_operands = 0 : i64, tpu.core_type = #tpu.core_type<tc>, window_params = [{transform_indices = @transform_0, window_bounds = array<i64: 8, 256>}, {transform_indices = @transform_1, window_bounds = array<i64: 8, 1>}, {transform_indices = @transform_2, window_bounds = array<i64: 8, 256>}]} {
    %c0 = arith.constant 0 : index
    %c0_0 = arith.constant 0 : index
    %0 = vector.load %arg2[%c0, %c0_0] : memref<8x256xf32, #tpu.memory_space<vmem>>, vector<8x256xf32>
    %c0_1 = arith.constant 0 : index
    %c0_2 = arith.constant 0 : index
    %1 = vector.load %arg3[%c0_1, %c0_2] : memref<8x1xf32, #tpu.memory_space<vmem>>, vector<8x1xf32>
    %2 = vector.broadcast %1 : vector<8x1xf32> to vector<8x256xf32>
    %3 = arith.addf %0, %2 : vector<8x256xf32>
    %c0_3 = arith.constant 0 : index
    %c0_4 = arith.constant 0 : index
    %4 = vector.load %arg4[%c0_3, %c0_4] : memref<8x256xf32, #tpu.memory_space<vmem>>, vector<8x256xf32>
    tpu.vector_store %arg4[%c0_3, %c0_4], %3 {strides = array<i32>} : memref<8x256xf32, #tpu.memory_space<vmem>>, vector<8x256xf32>,
    return
  }
  func.func @transform_0(%arg0: i32, %arg1: i32) -> (i32, i32) {
    %c0_i32 = arith.constant 0 : i32
    return %arg0, %arg1 : i32, i32
  }
  func.func @transform_1(%arg0: i32, %arg1: i32) -> (i32, i32) {
    %c0_i32 = arith.constant 0 : i32
    %c0_i32_0 = arith.constant 0 : i32
    return %arg0, %c0_i32 : i32, i32
  }
  func.func @transform_2(%arg0: i32, %arg1: i32) -> (i32, i32) {
    %c0_i32 = arith.constant 0 : i32
    return %arg0, %arg1 : i32, i32
  }
}

</mosaic_0001>

<bundles_post_ra>
// kernel: tpu_custom_call.1
= control target key start
LH: loop header
LB: loop body
LE: loop exit
PB: predicated region body
PF: predicated region fallthrough
CT: control target
= control target key end

     0   :  { %7 = vsyncpa [#allocation3], 0  ;;  %s138_s0 = inlined_call_operand.hbm [shape: f32[8,256], index: 0, kind: input, shape index: {}]   ;;  %s139_s1 = inlined_call_operand.vmem [shape: f32[8,1], index: 1, kind: input, shape index: {}]   ;;  %s140_s2 = inlined_call_operand.hbm [shape: f32[8,256], index: 2, kind: output, shape index: {}]  }
   0x1   :  { %8 = vsyncpa [#allocation4], 0  ;;  %s14_s11 = sshll.u32 %s138_s0, 4  ;;  %s111_s12 = smov [#allocation2]   ;;  %s15_s11 = int_to_ptr.hbm [resolvable:$true] %s14_s11 }
   0x2   :  { %s16_s13 = sshll.u32 %s111_s12, 4  ;;  %s17_s13 = int_to_ptr.vmem [resolvable:$true] %s16_s13 }
   0x3   :  { %19 = dma.hbm_to_vmem [thread:$0]  %s15_s11, 256, %s17_s13, [#allocation3]  }
   0x4   :  { %107 = dma.done.wait [#allocation3], 256  }
   0x5   :  { %108 = vsyncadd [#allocation3], 4294967040  ;;  %v112_v0 = vmov 0   ;;  %v28_v1 = vld [vmem:[%s139_s1] sm:$0xff]  ;;  %v27_v3 = vld [vmem:[#allocation2 + $0x8] sm:$0xff]  ;;  %s113_s16 = smov [#allocation5]  }
   0x6   :  { %58 = vset.pattern.permute.xlu0 %v112_v0  ;;  %v26_v2 = vld [vmem:[#allocation2] sm:$0xff]  ;;  %s43_s17 = sshll.u32 %s113_s16, 4  ;;  %s45_s19 = sshll.u32 %s140_s2, 4  ;;  %s44_s17 = int_to_ptr.vmem [resolvable:$true] %s43_s17  ;;  %s46_s19 = int_to_ptr.hbm [resolvable:$true] %s45_s19 }
   0x7   :  { %31 = vperm.xlu0 %58, %v28_v1  }
  0x79   :  { %v32_v4 = vpop.permute.xlu0 %31 }
  0x7a   :  { %v34_v5 = vadd.f32 %v32_v4, %v26_v2  ;;  %v35_v6 = vadd.f32 %v32_v4, %v27_v3 }
  0x7c   :  { %36 = vst [vmem:[#allocation5] sm:$0xff] %v34_v5 }
  0x7d   :  { %37 = vst [vmem:[#allocation5 + $0x8] sm:$0xff] %v35_v6 }
  0x7e   :  { %48 = dma.vmem_to_hbm [thread:$0]  %s44_s17, 256, %s46_s19, [#allocation4]  }
  0x7f   :  { %109 = dma.done.wait [#allocation4], 256  }
  0x80   :  { %110 = vsyncadd [#allocation4], 4294967040 }
  0x81   :  { %53 = vsyncpa [#allocation3], 1 }
  0x82   :  { %54 = vsyncpa [#allocation4], 1 }

</bundles_post_ra>
